<compile_context>
chip_gen: v5e
topology: v5e:2x2
jax: 0.10.0
libtpu: 0.0.40
codegen_flags: <defaults>
</compile_context>

<pallas_src>
import functools
import math

import jax
import jax.numpy as jnp
from jax.experimental import pallas as pl
from jax.experimental.pallas import tpu as pltpu

_MIB = 1024 * 1024


# --------------------------------------------------------------------------
# Kernels
# --------------------------------------------------------------------------
def _apply_activation(out, activation):
    if activation == "relu":
        return jnp.maximum(out, 0.0)
    if activation == "softplus":
        return jax.nn.softplus(out)
    return out  # activation False/None -> identity (module default)


def _ffn_kernel_acc(x_ref, w_ref, o_ref, acc_ref, *, activation):
    """3-D grid (M, N, K): f32 accumulator resident across the K axis."""
    k = pl.program_id(2)

    @pl.when(k == 0)
    def _():
        acc_ref[...] = jnp.zeros_like(acc_ref)

    acc_ref[...] += jnp.dot(
        x_ref[...], w_ref[...], preferred_element_type=jnp.float32
    )

    @pl.when(k == pl.num_programs(2) - 1)
    def _():
        o_ref[...] = _apply_activation(acc_ref[...], activation).astype(o_ref.dtype)


def _ffn_kernel_single(x_ref, w_ref, o_ref, *, activation):
    """Single-K-step kernel: no accumulator scratch, direct store."""
    out = jnp.dot(x_ref[...], w_ref[...], preferred_element_type=jnp.float32)
    o_ref[...] = _apply_activation(out, activation).astype(o_ref.dtype)


# --------------------------------------------------------------------------
# Tiling helpers
# --------------------------------------------------------------------------
def _round_up(x, mult):
    return ((x + mult - 1) // mult) * mult


def _vmem_budget_bytes():
    # Generation-aware VMEM budget (128 MiB physical on v5e/v6e, 64 MiB on v7x).
    try:
        cap = int(pltpu.get_tpu_info().vmem_capacity_bytes)
    except Exception:
        cap = 64 * _MIB  # conservative fallback (fits every generation)
    return int(0.75 * cap)


def _pick_tiles(m, k_pad, n, in_itemsize, out_itemsize, budget):
    sub = 16 if in_itemsize == 2 else 8

    tm = min(512, _round_up(m, sub))
    tn = n if n <= 512 else 512  # lane-dense output; 128-multiple when tiled

    def footprint(tk, nk):
        f = 2 * (tm * tk + tk * tn) * in_itemsize   # double-buffered x / w tiles
        f += 2 * tm * tn * out_itemsize             # double-buffered out tiles
        if nk > 1:
            f += tm * tn * 4                        # f32 accumulator scratch
        return f

    cands = sorted(
        {c for c in (k_pad, 4096, 2048, 1024, 512, 256, 128)
         if c <= k_pad and k_pad % c == 0},
        reverse=True,
    )
    tk = cands[-1]
    for c in cands:
        if footprint(c, k_pad // c) <= budget:
            tk = c
            break
    return tm, tn, tk, sub


# --------------------------------------------------------------------------
# Wrapper
# --------------------------------------------------------------------------
def feed_forward_network(x, weight, *, activation=None, compute_dtype=None):
    """Pallas TPU equivalent of FeedForwardNetwork.forward (Linear, bias=False).

    x:       [..., input_size]
    weight:  [output_size, input_size]   (PyTorch nn.Linear layout)
    activation: None | "relu" | "softplus"  (module default activation=False)
    compute_dtype: optionally cast operands (e.g. jnp.bfloat16) for MXU-rate
                   matmul while still accumulating in f32; output keeps x.dtype.
    """
    in_size = x.shape[-1]
    out_size = weight.shape[0]
    assert weight.shape[1] == in_size

    out_dtype = x.dtype
    lead = x.shape[:-1]
    m = int(math.prod(lead)) if lead else 1
    x2d = x.reshape(m, in_size)

    # K-major weight (one-time transpose): lane-dense, MXU-native RHS feed.
    w_t = weight.T  # [K, N]

    if compute_dtype is not None:
        x2d = x2d.astype(compute_dtype)
        w_t = w_t.astype(compute_dtype)

    in_itemsize = jnp.dtype(x2d.dtype).itemsize
    out_itemsize = jnp.dtype(out_dtype).itemsize

    # Pad K to a multiple of 128 (zeros contribute nothing to the contraction)
    # so the reduction tile always divides K exactly.
    k_pad = _round_up(in_size, 128)
    if k_pad != in_size:
        x2d = jnp.pad(x2d, ((0, 0), (0, k_pad - in_size)))
        w_t = jnp.pad(w_t, ((0, k_pad - in_size), (0, 0)))

    budget = _vmem_budget_bytes()
    tm, tn, tk, sub = _pick_tiles(m, k_pad, out_size, in_itemsize, out_itemsize, budget)

    # ----- resident-weight fast path: whole [K, N] weight parked in VMEM -----
    w_bytes = k_pad * out_size * in_itemsize
    resident_fp = (2 * tm * k_pad * in_itemsize
                   + 2 * w_bytes
                   + 2 * tm * out_size * out_itemsize)
    use_resident = (out_size <= 2048
                    and w_bytes <= 16 * _MIB
                    and resident_fp <= budget)

    if use_resident:
        # Megacore: expose >= 2 parallel M tiles when possible (v7x: 2 TCs).
        if pl.cdiv(m, tm) == 1 and m > sub:
            tm = _round_up(pl.cdiv(m, 2), sub)
        grid = (pl.cdiv(m, tm),)
        kernel = functools.partial(_ffn_kernel_single, activation=activation)
        in_specs = [
            pl.BlockSpec((tm, k_pad), lambda i: (i, 0)),
            # Constant index_map -> weight DMA'd once, stays resident in VMEM.
            pl.BlockSpec((k_pad, out_size), lambda i: (0, 0)),
        ]
        out_specs = pl.BlockSpec((tm, out_size), lambda i: (i, 0))
        scratch_shapes = []
        dim_sem = ("parallel",)
        vmem_need = (2 * tm * k_pad * in_itemsize
                     + 2 * w_bytes
                     + 2 * tm * out_size * out_itemsize)
        bytes_accessed = (m * k_pad * in_itemsize
                          + w_bytes
                          + m * out_size * out_itemsize)
    else:
        nk = k_pad // tk
        # Megacore: expose >= 2 parallel blocks on (i, j) when possible.
        if pl.cdiv(m, tm) == 1 and pl.cdiv(out_size, tn) == 1:
            if m > sub:
                tm = _round_up(pl.cdiv(m, 2), sub)
            elif out_size >= 256:
                tn = _round_up(pl.cdiv(out_size, 2), 128)

        if nk == 1:
            grid = (pl.cdiv(m, tm), pl.cdiv(out_size, tn))
            kernel = functools.partial(_ffn_kernel_single, activation=activation)
            in_specs = [
                pl.BlockSpec((tm, tk), lambda i, j: (i, 0)),
                pl.BlockSpec((tk, tn), lambda i, j: (0, j)),
            ]
            out_specs = pl.BlockSpec((tm, tn), lambda i, j: (i, j))
            scratch_shapes = []
            dim_sem = ("parallel", "parallel")
        else:
            grid = (pl.cdiv(m, tm), pl.cdiv(out_size, tn), nk)
            kernel = functools.partial(_ffn_kernel_acc, activation=activation)
            in_specs = [
                pl.BlockSpec((tm, tk), lambda i, j, k: (i, k)),
                pl.BlockSpec((tk, tn), lambda i, j, k: (k, j)),
            ]
            out_specs = pl.BlockSpec((tm, tn), lambda i, j, k: (i, j))
            scratch_shapes = [pltpu.VMEM((tm, tn), jnp.float32)]
            dim_sem = ("parallel", "parallel", "arbitrary")

        vmem_need = (2 * (tm * tk + tk * tn) * in_itemsize
                     + 2 * tm * tn * out_itemsize
                     + (tm * tn * 4 if nk > 1 else 0))
        # Actual tiled HBM traffic: x re-read per N tile, w re-read per M tile.
        bytes_accessed = (pl.cdiv(out_size, tn) * m * k_pad * in_itemsize
                          + pl.cdiv(m, tm) * k_pad * out_size * in_itemsize
                          + m * out_size * out_itemsize)

    vmem_limit = int(min(budget, max(vmem_need + 8 * _MIB, 16 * _MIB)))

    cost = pl.CostEstimate(
        flops=2 * m * k_pad * out_size,
        transcendentals=(m * out_size if activation == "softplus" else 0),
        bytes_accessed=int(bytes_accessed),
    )

    out2d = pl.pallas_call(
        kernel,
        out_shape=jax.ShapeDtypeStruct((m, out_size), out_dtype),
        grid_spec=pltpu.PrefetchScalarGridSpec(
            num_scalar_prefetch=0,
            grid=grid,
            in_specs=in_specs,
            out_specs=out_specs,
            scratch_shapes=scratch_shapes,
        ),
        compiler_params=pltpu.CompilerParams(
            dimension_semantics=dim_sem,
            vmem_limit_bytes=vmem_limit,
        ),
        cost_estimate=cost,
    )(x2d, w_t)

    return out2d.reshape(*lead, out_size)


def xavier_uniform(key, out_size, in_size, dtype=jnp.float32):
    # Matches torch.nn.init.xavier_uniform_ on a [out, in] Linear weight.
    bound = math.sqrt(6.0 / (in_size + out_size))
    return jax.random.uniform(
        key, (out_size, in_size), dtype=dtype, minval=-bound, maxval=bound
    )


if __name__ == "__main__":
    key = jax.random.PRNGKey(0)
    kx, kw = jax.random.split(key)

    batch, seq, input_size, output_size = 2, 8, 32, 64

    x = jax.random.normal(kx, (batch, seq, input_size), dtype=jnp.float32)
    weight = xavier_uniform(kw, output_size, input_size)

    # Default module config: activation=False, bias=False.
    # TODO(synk): nn.Dropout(0.5) is constructed but never applied in forward,
    # so it is intentionally omitted here.
    out = feed_forward_network(x, weight, activation=None)
    out = jax.block_until_ready(out)

    # Reference check in plain JAX (same semantics as torch: x @ W.T).
    ref = x @ weight.T
    assert out.shape == (batch, seq, output_size)
    assert jnp.allclose(out, ref, atol=1e-5, rtol=1e-5)

    # Also exercise an activation path (softplus) for coverage.
    out_sp = jax.block_until_ready(
        feed_forward_network(x, weight, activation="softplus")
    )
    ref_sp = jax.nn.softplus(ref)
    assert jnp.allclose(out_sp, ref_sp, atol=1e-5, rtol=1e-5)

    print("KERNEL_OK")
</pallas_src>

<mosaic_0001>
module attributes {stable_mosaic.version = 11 : i64} {
  func.func @_ffn_kernel_single(%arg0: i32, %arg1: memref<8x128xf32, #tpu.memory_space<vmem>>, %arg2: memref<128x64xf32, #tpu.memory_space<vmem>>, %arg3: memref<8x64xf32, #tpu.memory_space<vmem>>) attributes {dimension_semantics = [#tpu.dimension_semantics<parallel>], iteration_bounds = array<i64: 2>, scalar_prefetch = 0 : i64, scratch_operands = 0 : i64, tpu.core_type = #tpu.core_type<tc>, window_params = [{transform_indices = @transform_0, window_bounds = array<i64: 8, 128>}, {pipeline_mode = #tpu.pipeline_mode<synchronous>, transform_indices = @transform_1, window_bounds = array<i64: 128, 64>}, {transform_indices = @transform_2, window_bounds = array<i64: 8, 64>}]} {
    %c0 = arith.constant 0 : index
    %c0_0 = arith.constant 0 : index
    %0 = vector.load %arg1[%c0, %c0_0] : memref<8x128xf32, #tpu.memory_space<vmem>>, vector<8x128xf32>
    %c0_1 = arith.constant 0 : index
    %c0_2 = arith.constant 0 : index
    %1 = vector.load %arg2[%c0_1, %c0_2] : memref<128x64xf32, #tpu.memory_space<vmem>>, vector<128x64xf32>
    %cst = arith.constant dense<0.000000e+00> : vector<8x64xf32>
    %2 = tpu.matmul %0, %1, %cst {dimension_numbers = #tpu.dot_dimension_numbers<[1], [0], [0], [1], [0, 0, 1, 1], [], []>} : vector<8x128xf32>, vector<128x64xf32>, vector<8x64xf32> -> vector<8x64xf32>
    %c0_3 = arith.constant 0 : index
    %c0_4 = arith.constant 0 : index
    %3 = vector.load %arg3[%c0_3, %c0_4] : memref<8x64xf32, #tpu.memory_space<vmem>>, vector<8x64xf32>
    tpu.vector_store %arg3[%c0_3, %c0_4], %2 {strides = array<i32>} : memref<8x64xf32, #tpu.memory_space<vmem>>, vector<8x64xf32>,
    return
  }
  func.func @transform_0(%arg0: i32) -> (i32, i32) {
    %c0_i32 = arith.constant 0 : i32
    %c0_i32_0 = arith.constant 0 : i32
    return %arg0, %c0_i32 : i32, i32
  }
  func.func @transform_1(%arg0: i32) -> (i32, i32) {
    %c0_i32 = arith.constant 0 : i32
    %c0_i32_0 = arith.constant 0 : i32
    %c0_i32_1 = arith.constant 0 : i32
    return %c0_i32, %c0_i32_0 : i32, i32
  }
  func.func @transform_2(%arg0: i32) -> (i32, i32) {
    %c0_i32 = arith.constant 0 : i32
    %c0_i32_0 = arith.constant 0 : i32
    return %arg0, %c0_i32 : i32, i32
  }
}

</mosaic_0001>

<bundles_post_ra>
// kernel: tpu_custom_call.1
= control target key start
LH: loop header
LB: loop body
LE: loop exit
PB: predicated region body
PF: predicated region fallthrough
CT: control target
= control target key end

     0   :  { %7 = vsyncpa [#allocation3], 0  ;;  %s514_s0 = inlined_call_operand.vmem [shape: f32[16,128], index: 0, kind: input, shape index: {}]   ;;  %s515_s1 = inlined_call_operand.vmem [shape: f32[128,64], index: 1, kind: input, shape index: {}]   ;;  %s516_s2 = inlined_call_operand.hbm [shape: f32[16,64], index: 2, kind: output, shape index: {}]  }
   0x1   :  { %9 = vsyncpa [#allocation3 + $0x1], 0  ;;  %s381_s9 = smov 0   ;;  %s383_s10 = smov 0  }
   0x2   :  { %s385_s11 = smov 0   ;;  %s387_s12 = smov 0  }
   0x3 LB: > { %s402_s13 = sadd.s32 4294967295, %s364_s12   ;;  %s253_s14 = sadd.s32 4294967294, %s364_s12   ;;  %s364_s12 = sphi %s387_s12, %s522_s12   ;;  %s360_s11 = sphi %s385_s11, %s521_s11   ;;  %s356_s10 = sphi %s383_s10, %s520_s10   ;;  %s352_s9 = sphi %s381_s9, %s519_s9  }
   0x4   : > { %s406_s15 = sadd.s32 1, %s364_s12   ;;  %s69_s16 = sadd.s32 1, %s360_s11 }
   0x5   : > { %s66_s17 = ssub.s32 %s364_s12, %s406_s15  ;;  %p79_p0 = scmp.ne.s32.totalorder %s360_s11, %s356_s10 }
   0x6   : > { %p67_p1 = scmp.eq.s32.totalorder %s66_s17, 0  ;;  %p80_p2 = scmp.eq.s32.totalorder %s402_s13, 1 }
   0x7   : > { %p85_p3 = scmp.ne.s32.totalorder %s356_s10, %s352_s9  ;;  %p86_p4 = scmp.eq.s32.totalorder %s253_s14, 1 }
   0x8   : > { %s417_s18 = scalar_select %p67_p1, %s360_s11, %s69_s16  }
   0x9   : > { %p419_p5 = por %p80_p2, %p79_p0  ;;  %p423_p6 = por %p86_p4, %p85_p3 }
   0xa   : > { %p256_p7 = scmp.ge.s32.totalorder %s364_s12, 1  ;;  %p114_p8 = scmp.lt.s32.totalorder %s364_s12, 3 }
   0xc   : > { %p115_p9 = pnand %p256_p7, %p114_p8 }
   0xd   : > { %p135_p10 = scmp.lt.s32.totalorder (!%p115_p9), %s402_s13, 1  ;;  %s132_s17 = sand.u32 (!%p115_p9), 1, %s356_s10  }
   0xe   : > { %118 = sbr.rel (%p115_p9) target bundleno = 180 (0xb4), region = 28  ;;  %s257_s21 = sshll.u32 (!%p115_p9), %s132_s17, 3 }
   0xf   : > { %s260_s22 = sshll.u32 (!%p115_p9), %s402_s13, 3  ;;  %s134_s26 = scalar_lea.vmem (!%p115_p9), [#allocation2], %s257_s21 }
  0x10   : > { %s189_s25 = scalar_lea.hbm (!%p115_p9), %s516_s2, %s260_s22  ;;  %s191_s27 = sshll.u32 (!%p115_p9), %s134_s26, 4  ;;  %s192_s27 = int_to_ptr.vmem [resolvable:$true] %s191_s27 }
  0x11   : > { %s193_s28 = sshll.u32 (!%p115_p9), %s189_s25, 4  ;;  %s322_s5 = scalar_lea.hbm (!%p115_p9), %s516_s2, 16  ;;  %s194_s28 = int_to_ptr.hbm [resolvable:$true] %s193_s28 }
  0x12   : > { %s316_s30 = sshra.s32 (!%p115_p9), %s194_s28, 4  ;;  %s317_s30 = int_to_ptr.hbm [resolvable:$true] %s316_s30 }
  0x13   : > { %v155_v0 = vld [vmem:[%s515_s1 + $0x78] sm:$0xff]  ;;  %v154_v1 = vld [vmem:[%s515_s1 + $0x70] sm:$0xff]  ;;  %v153_v2 = vld [vmem:[%s515_s1 + $0x68] sm:$0xff]  ;;  %s136_s24 = scalar_select %p135_p10, %s402_s13, 1  ;;  %vm176_vm0 = vcmask 523264  }
  0x14   : > { %156 = vmatpush.msra.mxu0 %v155_v0  ;;  %v152_v3 = vld [vmem:[%s515_s1 + $0x60] sm:$0xff]  ;;  %v151_v4 = vld [vmem:[%s515_s1 + $0x58] sm:$0xff]  ;;  %v150_v5 = vld [vmem:[%s515_s1 + $0x50] sm:$0xff]  ;;  %s318_s3 = scalar_lea.hbm %s317_s30, 8  ;;  %p323_p0 = scmp.lt.s32.totalorder %s317_s30, %s516_s2 }
  0x15   : > { %v149_v6 = vld [vmem:[%s515_s1 + $0x48] sm:$0xff]  ;;  %v148_v7 = vld [vmem:[%s515_s1 + $0x40] sm:$0xff]  ;;  %v147_v8 = vld [vmem:[%s515_s1 + $0x38] sm:$0xff]  ;;  %s258_s29 = sshll.u32 %s136_s24, 3  ;;  %p319_p11 = scmp.ne.s32.totalorder %s317_s30, %s318_s3 }
  0x16   : > { %157 = vmatpush.msra.mxu0 %v154_v1  ;;  %v146_v9 = vld [vmem:[%s515_s1 + $0x30] sm:$0xff]  ;;  %v145_v10 = vld [vmem:[%s515_s1 + $0x28] sm:$0xff]  ;;  %v144_v11 = vld [vmem:[%s515_s1 + $0x20] sm:$0xff]  ;;  %s138_s8 = scalar_lea.vmem %s514_s0, %s258_s29  ;;  %s179_s29 = scalar_lea.sflag [#allocation3], %s132_s17 }
  0x17   : > { %v143_v12 = vld [vmem:[%s515_s1 + $0x18] sm:$0xff]  ;;  %v142_v13 = vld [vmem:[%s515_s1 + $0x10] sm:$0xff]  ;;  %v141_v14 = vld [vmem:[%s515_s1 + $0x8] sm:$0xff]  ;;  %p320_p12 = pnand %p319_p11, %p419_p5  ;;  %p324_p1 = scmp.lt.s32.totalorder %s322_s5, %s318_s3 }
  0x18   : > { %158 = vmatpush.msra.mxu0 %v153_v2  ;;  %v140_v15 = vld [vmem:[%s515_s1] sm:$0xff] }
  0x19   : > { %v139_v16 = vld [vmem:[%s138_s8] sm:$0xff]  ;;  %p321_p13 = pneg %p320_p12  ;;  %p325_p2 = por %p324_p1, %p323_p0 }
  0x1a   : > { %159 = vmatpush.msra.mxu0 %v152_v3 }
  0x1b   : > { %p326_p3 = pnand %p325_p2, %p321_p13 }
  0x1c   : > { %160 = vmatpush.msra.mxu0 %v151_v4 }
  0x1e   : > { %161 = vmatpush.msra.mxu0 %v150_v5 }
  0x20   : > { %162 = vmatpush.msra.mxu0 %v149_v6 }
  0x22   : > { %163 = vmatpush.msra.mxu0 %v148_v7 }
  0x24   : > { %164 = vmatpush.msra.mxu0 %v147_v8 }
  0x26   : > { %165 = vmatpush.msra.mxu0 %v146_v9 }
  0x28   : > { %166 = vmatpush.msra.mxu0 %v145_v10 }
  0x2a   : > { %167 = vmatpush.msra.mxu0 %v144_v11 }
  0x2c   : > { %168 = vmatpush.msra.mxu0 %v143_v12 }
  0x2e   : > { %169 = vmatpush.msra.mxu0 %v142_v13 }
  0x30   : > { %170 = vmatpush.msra.mxu0 %v141_v14 }
  0x32   : > { %171 = vmatpush.msra.mxu0 %v140_v15 }
  0x33   : > { %172 = vmatmul.f32.vlgmr.msra.gmra.mxu0 %v139_v16 }
  0xb0   : > { %v173_v17 = vpop.f32.mrf.mxu0 }
  0xb1   : > { %177 = vst.msk [vmem:[%s134_s26] sm:$0xff] %vm176_vm0, %v173_v17 }
  0xb2   : > { %329 = shalt.err (!%p326_p3)
}
  0xb3   : > { %263 = dma.vmem_to_hbm [thread:$0]  (%p419_p5), %s192_s27, 128, %s194_s28, %s179_s29  }
  0xb4 PF: > { %p269_p4 = scmp.ge.s32.totalorder %s364_s12, 2  ;;  %s205_s8 = sand.u32 1, %s352_s9  }
  0xb5   : > { %s206_s14 = scalar_lea.sflag [#allocation3], %s205_s8 }
  0xb6   : > { %p266_p7 = pnand %p269_p4, %p423_p6 }
  0xb8   : > { %p267_p8 = pneg %p266_p7 }
  0xba   : > { %347 = dma.done.wait (%p267_p8), %s206_s14, 128  }
  0xbb   : > { %349 = vsyncadd (%p267_p8), %s206_s14, 4294967168  ;;  %p12_p9 = scmp.ge.s32.totalorder %s406_s15, 4   ;;  %s519_s9 = smov %s356_s10 }
  0xbc   : > { %s520_s10 = smov %s360_s11  ;;  %s521_s11 = smov %s417_s18 }
  0xbd   : > { %s522_s12 = smov %s406_s15  ;;  %14 = sbr.rel (!%p12_p9) target bundleno = 3 (0x3), region = 63 }
  0xc2   :  { %212 = vsyncpa [#allocation3], 1 }
  0xc3   :  { %214 = vsyncpa [#allocation3 + $0x1], 1 }

</bundles_post_ra>
